<compile_context>
chip_gen: v7x
topology: tpu7x:2x2x1
jax: 0.10.0
libtpu: 0.0.40
codegen_flags: <defaults>
</compile_context>

<pallas_src>
import math

import jax
import jax.numpy as jnp
from jax.experimental import pallas as pl
from jax.experimental.pallas import tpu as pltpu


def _mlp_kernel(s_ref, w1_ref, b1_ref, w2_ref, b2_ref, w3_ref, b3_ref, o_ref):
    # One batch tile of the full 3-layer MLP.  Matmul operands may be bf16;
    # accumulation and biases are f32.
    x = s_ref[...]
    h1 = jnp.dot(x, w1_ref[...], preferred_element_type=jnp.float32) + b1_ref[...]
    h1 = jnp.maximum(h1, 0.0)
    h2 = jnp.dot(h1.astype(w2_ref.dtype), w2_ref[...],
                 preferred_element_type=jnp.float32) + b2_ref[...]
    h2 = jnp.maximum(h2, 0.0)
    # Output layer (fan_out == 1): VPU multiply + cross-lane reduce instead of an
    # N=1 MXU matmul.  w3 is supplied as a (1, H) row, b3 as an SMEM scalar.
    w3_row = w3_ref[...].astype(jnp.float32)                       # (1, H)
    out = jnp.sum(h2 * w3_row, axis=-1, keepdims=True) + b3_ref[0, 0]
    o_ref[...] = out.astype(o_ref.dtype)


def _round_up(x: int, m: int) -> int:
    return (x + m - 1) // m * m


def expectile_value_critic(state, params, *, batch_tile=None,
                           compute_dtype=jnp.float32):
    """Forward pass of ExpectileValueCritic as a Pallas TPU kernel.

    state : (B, state_dim) float32
    params: dict with w1 (S,H), b1 (1,H), w2 (H,H), b2 (1,H), w3 (H,1), b3 (1,1)
            (weights stored as (in_dim, out_dim), i.e. transposed vs nn.Linear)
    compute_dtype: dtype of the matmul operands (jnp.bfloat16 halves HBM/VMEM
                   traffic; accumulation and biases stay f32).
    returns (B, 1) float32
    """
    B, S = state.shape
    H = params["w1"].shape[1]

    # ---- batch tile selection ---------------------------------------------
    # f32 sublane is 8; 256-1024 rows fill the MXU M dim and amortize the
    # ~0.35 us per-grid-step overhead.  Default target: 512 rows.
    if batch_tile is None:
        tb = min(_round_up(B, 8), 512)
    else:
        tb = _round_up(int(batch_tile), 8)
    Bp = _round_up(B, tb)
    if Bp != B:
        state = jnp.pad(state, ((0, Bp - B), (0, 0)))
    grid = (Bp // tb,)

    # ---- operand dtypes ----------------------------------------------------
    cdt = jnp.dtype(compute_dtype)
    x = state.astype(cdt)
    w1 = params["w1"].astype(cdt)
    w2 = params["w2"].astype(cdt)
    w3_row = params["w3"].reshape(1, H).astype(cdt)        # column -> row for VPU reduce
    b1 = params["b1"].reshape(1, H).astype(jnp.float32)
    b2 = params["b2"].reshape(1, H).astype(jnp.float32)
    b3 = params["b3"].reshape(1, 1).astype(jnp.float32)    # SMEM scalar

    # ---- VMEM budget (explicit limit instead of the scoped default) --------
    itemsize = cdt.itemsize
    est = (2 * tb * S * itemsize                      # streamed state, 2 buffers
           + (S * H + H * H + H) * itemsize           # w1, w2, w3 (single-buffered)
           + 2 * H * 4                                # b1, b2 (f32)
           + 2 * tb * 4                               # output, 2 buffers
           + 3 * tb * H * 4)                          # live f32 intermediates
    vmem_limit = int(min(max(2 * est, 32 * 1024 * 1024), 64 * 1024 * 1024))

    # ---- advisory cost hint for XLA's scheduler -----------------------------
    flops = 2 * Bp * (S * H + H * H + H)
    bytes_accessed = (Bp * S * itemsize + (S * H + H * H + H) * itemsize
                      + 2 * H * 4 + 4 + Bp * 4)
    cost = pl.CostEstimate(flops=flops, transcendentals=0,
                           bytes_accessed=bytes_accessed)

    # Constant-index weights/biases: keep a single resident VMEM copy
    # (default pipelining would allocate 2 buffers each).
    def const_spec(shape):
        return pl.BlockSpec(shape, lambda i: (0, 0), pipeline_mode=pl.Buffered(1))

    out = pl.pallas_call(
        _mlp_kernel,
        out_shape=jax.ShapeDtypeStruct((Bp, 1), jnp.float32),
        grid=grid,
        in_specs=[
            # streamed state tiles: default double-buffering overlaps DMA with
            # compute (bump to pl.Buffered(3) if the DMA is still exposed at tiny S)
            pl.BlockSpec((tb, S), lambda i: (i, 0)),
            const_spec((S, H)),                                   # w1
            const_spec((1, H)),                                   # b1
            const_spec((H, H)),                                   # w2
            const_spec((1, H)),                                   # b2
            const_spec((1, H)),                                   # w3 (as a row)
            pl.BlockSpec(memory_space=pltpu.MemorySpace.SMEM),    # b3 scalar
        ],
        out_specs=pl.BlockSpec((tb, 1), lambda i: (i, 0)),
        compiler_params=pltpu.CompilerParams(
            dimension_semantics=("parallel",),   # batch axis shards across TCs (v7x)
            vmem_limit_bytes=vmem_limit,
        ),
        cost_estimate=cost,
    )(x, w1, b1, w2, b2, w3_row, b3)

    return out[:B]


def init_params(key, state_dim, hidden_dim):
    """Deterministic init mimicking PyTorch nn.Linear default U[-1/sqrt(fan_in), 1/sqrt(fan_in)]."""
    ks = jax.random.split(key, 6)

    def linear(kw, kb, fan_in, fan_out):
        bound = 1.0 / math.sqrt(fan_in)
        w = jax.random.uniform(kw, (fan_in, fan_out), jnp.float32, -bound, bound)
        b = jax.random.uniform(kb, (1, fan_out), jnp.float32, -bound, bound)
        return w, b

    w1, b1 = linear(ks[0], ks[1], state_dim, hidden_dim)
    w2, b2 = linear(ks[2], ks[3], hidden_dim, hidden_dim)
    w3, b3 = linear(ks[4], ks[5], hidden_dim, 1)
    return {"w1": w1, "b1": b1, "w2": w2, "b2": b2, "w3": w3, "b3": b3}


def _reference(state, p):
    x = jnp.maximum(state @ p["w1"] + p["b1"], 0.0)
    x = jnp.maximum(x @ p["w2"] + p["b2"], 0.0)
    return x @ p["w3"] + p["b3"]


if __name__ == "__main__":
    key = jax.random.PRNGKey(0)
    k_state, k_params, k_state2 = jax.random.split(key, 3)

    B, STATE_DIM, HIDDEN_DIM = 8, 16, 32
    params = init_params(k_params, STATE_DIM, HIDDEN_DIM)

    # 1) f32, single tile
    state = jax.random.normal(k_state, (B, STATE_DIM), jnp.float32)
    out = jax.block_until_ready(expectile_value_critic(state, params))
    ref = _reference(state, params)
    assert out.shape == (B, 1)
    assert jnp.allclose(out, ref, atol=1e-5, rtol=1e-5), "f32 mismatch vs reference"

    # 2) f32, multi-step grid + ragged batch (exercises tiling + padding path)
    B2 = 20
    state2 = jax.random.normal(k_state2, (B2, STATE_DIM), jnp.float32)
    out2 = jax.block_until_ready(expectile_value_critic(state2, params, batch_tile=8))
    ref2 = _reference(state2, params)
    assert out2.shape == (B2, 1)
    assert jnp.allclose(out2, ref2, atol=1e-5, rtol=1e-5), "tiled f32 mismatch vs reference"

    # 3) bf16 matmul operands (f32 accumulation) — loose tolerance vs f32 reference
    out_bf16 = jax.block_until_ready(
        expectile_value_critic(state2, params, batch_tile=8, compute_dtype=jnp.bfloat16))
    assert out_bf16.shape == (B2, 1)
    assert jnp.allclose(out_bf16, ref2, atol=1e-1, rtol=1e-1), "bf16 mismatch vs reference"

    print("KERNEL_OK")
</pallas_src>

<mosaic_0001>
module attributes {stable_mosaic.version = 11 : i64} {
  func.func @_mlp_kernel(%arg0: i32, %arg1: memref<8x16xf32, #tpu.memory_space<vmem>>, %arg2: memref<16x32xf32, #tpu.memory_space<vmem>>, %arg3: memref<1x32xf32, #tpu.memory_space<vmem>>, %arg4: memref<32x32xf32, #tpu.memory_space<vmem>>, %arg5: memref<1x32xf32, #tpu.memory_space<vmem>>, %arg6: memref<1x32xf32, #tpu.memory_space<vmem>>, %arg7: memref<1x1xf32, #tpu.memory_space<smem>>, %arg8: memref<8x1xf32, #tpu.memory_space<vmem>>) attributes {dimension_semantics = [#tpu.dimension_semantics<parallel>], iteration_bounds = array<i64: 1>, scalar_prefetch = 0 : i64, scratch_operands = 0 : i64, tpu.core_type = #tpu.core_type<tc>, window_params = [{transform_indices = @transform_0, window_bounds = array<i64: 8, 16>}, {pipeline_mode = #tpu.pipeline_mode<synchronous>, transform_indices = @transform_1, window_bounds = array<i64: 16, 32>}, {pipeline_mode = #tpu.pipeline_mode<synchronous>, transform_indices = @transform_2, window_bounds = array<i64: 1, 32>}, {pipeline_mode = #tpu.pipeline_mode<synchronous>, transform_indices = @transform_3, window_bounds = array<i64: 32, 32>}, {pipeline_mode = #tpu.pipeline_mode<synchronous>, transform_indices = @transform_4, window_bounds = array<i64: 1, 32>}, {pipeline_mode = #tpu.pipeline_mode<synchronous>, transform_indices = @transform_5, window_bounds = array<i64: 1, 32>}, {transform_indices = @transform_6, window_bounds = array<i64: 1, 1>}, {transform_indices = @transform_7, window_bounds = array<i64: 8, 1>}]} {
    %c0 = arith.constant 0 : index
    %c0_0 = arith.constant 0 : index
    %0 = vector.load %arg1[%c0, %c0_0] : memref<8x16xf32, #tpu.memory_space<vmem>>, vector<8x16xf32>
    %c0_1 = arith.constant 0 : index
    %c0_2 = arith.constant 0 : index
    %1 = vector.load %arg2[%c0_1, %c0_2] : memref<16x32xf32, #tpu.memory_space<vmem>>, vector<16x32xf32>
    %cst = arith.constant dense<0.000000e+00> : vector<8x32xf32>
    %2 = tpu.matmul %0, %1, %cst {dimension_numbers = #tpu.dot_dimension_numbers<[1], [0], [0], [1], [0, 0, 1, 1], [], []>} : vector<8x16xf32>, vector<16x32xf32>, vector<8x32xf32> -> vector<8x32xf32>
    %c0_3 = arith.constant 0 : index
    %c0_4 = arith.constant 0 : index
    %3 = vector.load %arg3[%c0_3, %c0_4] : memref<1x32xf32, #tpu.memory_space<vmem>>, vector<1x32xf32>
    %4 = vector.broadcast %3 : vector<1x32xf32> to vector<8x32xf32>
    %5 = arith.addf %2, %4 : vector<8x32xf32>
    %cst_5 = arith.constant 0.000000e+00 : f32
    %6 = vector.broadcast %cst_5 : f32 to vector<8x32xf32>
    %7 = arith.maximumf %5, %6 : vector<8x32xf32>
    %c0_6 = arith.constant 0 : index
    %c0_7 = arith.constant 0 : index
    %8 = vector.load %arg4[%c0_6, %c0_7] : memref<32x32xf32, #tpu.memory_space<vmem>>, vector<32x32xf32>
    %cst_8 = arith.constant dense<0.000000e+00> : vector<8x32xf32>
    %9 = tpu.matmul %7, %8, %cst_8 {dimension_numbers = #tpu.dot_dimension_numbers<[1], [0], [0], [1], [0, 0, 1, 1], [], []>} : vector<8x32xf32>, vector<32x32xf32>, vector<8x32xf32> -> vector<8x32xf32>
    %c0_9 = arith.constant 0 : index
    %c0_10 = arith.constant 0 : index
    %10 = vector.load %arg5[%c0_9, %c0_10] : memref<1x32xf32, #tpu.memory_space<vmem>>, vector<1x32xf32>
    %11 = vector.broadcast %10 : vector<1x32xf32> to vector<8x32xf32>
    %12 = arith.addf %9, %11 : vector<8x32xf32>
    %cst_11 = arith.constant 0.000000e+00 : f32
    %13 = vector.broadcast %cst_11 : f32 to vector<8x32xf32>
    %14 = arith.maximumf %12, %13 : vector<8x32xf32>
    %c0_12 = arith.constant 0 : index
    %c0_13 = arith.constant 0 : index
    %15 = vector.load %arg6[%c0_12, %c0_13] : memref<1x32xf32, #tpu.memory_space<vmem>>, vector<1x32xf32>
    %16 = vector.broadcast %15 : vector<1x32xf32> to vector<8x32xf32>
    %17 = arith.mulf %14, %16 : vector<8x32xf32>
    %cst_14 = arith.constant dense<0.000000e+00> : vector<8xf32>
    %18 = vector.multi_reduction <add>, %17, %cst_14 [1] : vector<8x32xf32> to vector<8xf32>
    %19 = vector.shape_cast %18 : vector<8xf32> to vector<8x1xf32>
    %c0_15 = arith.constant 0 : index
    %c0_16 = arith.constant 0 : index
    %20 = memref.load %arg7[%c0_15, %c0_16] : memref<1x1xf32, #tpu.memory_space<smem>>
    %21 = vector.broadcast %20 : f32 to vector<8x1xf32>
    %22 = arith.addf %19, %21 : vector<8x1xf32>
    %c0_17 = arith.constant 0 : index
    %c0_18 = arith.constant 0 : index
    %23 = vector.load %arg8[%c0_17, %c0_18] : memref<8x1xf32, #tpu.memory_space<vmem>>, vector<8x1xf32>
    tpu.vector_store %arg8[%c0_17, %c0_18], %22 {strides = array<i32>} : memref<8x1xf32, #tpu.memory_space<vmem>>, vector<8x1xf32>,
    return
  }
  func.func @transform_0(%arg0: i32) -> (i32, i32) {
    %c0_i32 = arith.constant 0 : i32
    %c0_i32_0 = arith.constant 0 : i32
    return %arg0, %c0_i32 : i32, i32
  }
  func.func @transform_1(%arg0: i32) -> (i32, i32) {
    %c0_i32 = arith.constant 0 : i32
    %c0_i32_0 = arith.constant 0 : i32
    %c0_i32_1 = arith.constant 0 : i32
    return %c0_i32, %c0_i32_0 : i32, i32
  }
  func.func @transform_2(%arg0: i32) -> (i32, i32) {
    %c0_i32 = arith.constant 0 : i32
    %c0_i32_0 = arith.constant 0 : i32
    %c0_i32_1 = arith.constant 0 : i32
    return %c0_i32, %c0_i32_0 : i32, i32
  }
  func.func @transform_3(%arg0: i32) -> (i32, i32) {
    %c0_i32 = arith.constant 0 : i32
    %c0_i32_0 = arith.constant 0 : i32
    %c0_i32_1 = arith.constant 0 : i32
    return %c0_i32, %c0_i32_0 : i32, i32
  }
  func.func @transform_4(%arg0: i32) -> (i32, i32) {
    %c0_i32 = arith.constant 0 : i32
    %c0_i32_0 = arith.constant 0 : i32
    %c0_i32_1 = arith.constant 0 : i32
    return %c0_i32, %c0_i32_0 : i32, i32
  }
  func.func @transform_5(%arg0: i32) -> (i32, i32) {
    %c0_i32 = arith.constant 0 : i32
    %c0_i32_0 = arith.constant 0 : i32
    %c0_i32_1 = arith.constant 0 : i32
    return %c0_i32, %c0_i32_0 : i32, i32
  }
  func.func @transform_6(%arg0: i32) -> (i32, i32) {
    %c0_i32 = arith.constant 0 : i32
    %c0_i32_0 = arith.constant 0 : i32
    %c0_i32_1 = arith.constant 0 : i32
    return %c0_i32, %c0_i32_0 : i32, i32
  }
  func.func @transform_7(%arg0: i32) -> (i32, i32) {
    %c0_i32 = arith.constant 0 : i32
    %c0_i32_0 = arith.constant 0 : i32
    return %arg0, %c0_i32 : i32, i32
  }
}

</mosaic_0001>

<bundles_post_ra>
// kernel: tpu_custom_call.1
= control target key start
LH: loop header
LB: loop body
LE: loop exit
PB: predicated region body
PF: predicated region fallthrough
CT: control target
= control target key end

     0   :  { %13 = vsyncpa [#allocation4], 0  ;;  %s482_s0 = inlined_call_operand.hbm [shape: f32[8,16], index: 0, kind: input, shape index: {}]   ;;  %s483_s1 = inlined_call_operand.hbm [shape: f32[16,32], index: 1, kind: input, shape index: {}]   ;;  %s484_s2 = inlined_call_operand.vmem [shape: f32[1,32], index: 2, kind: input, shape index: {}]   ;;  %s485_s3 = inlined_call_operand.hbm [shape: f32[32,32], index: 3, kind: input, shape index: {}]   ;;  %s486_s4 = inlined_call_operand.vmem [shape: f32[1,32], index: 4, kind: input, shape index: {}]   ;;  %s487_s5 = inlined_call_operand.vmem [shape: f32[1,32], index: 5, kind: input, shape index: {}]   ;;  %s488_s6 = inlined_call_operand.<no memory space> [shape: f32[1,1], index: 6, kind: input, shape index: {}]   ;;  %s489_s7 = inlined_call_operand.vmem [shape: f32[8,1], index: 7, kind: output, shape index: {}]  }
   0x1   :  { %14 = vsyncpa [#allocation6], 0  ;;  %s377_s24 = smov [#allocation5]   ;;  %s307_s28 = scalar_lea.hbm %s483_s1, 256 }
   0x2   :  { %s30_s25 = sshll.u32 %s377_s24, 4  ;;  %p308_p0 = scmp.ne.s32.totalorder %s483_s1, %s307_s28  ;;  %s31_s25 = int_to_ptr.vmem [resolvable:$true] %s30_s25 }
   0x3   :  { %p311_p1 = scmp.lt.u32.totalorder %s307_s28, %s483_s1 }
   0x5   :  { %p313_p2 = pnand %p311_p1, %p308_p0 }
   0x7   :  { %316 = shalt.err (!%p313_p2)
}
   0x8   :  { %s317_s10 = scalar_lea.vmem %s31_s25, 256  ;;  %p322_p4 = scmp.lt.s32.totalorder %s31_s25, %s31_s25 }
   0x9   :  { %p318_p3 = scmp.ne.s32.totalorder %s31_s25, %s317_s10  ;;  %p323_p5 = scmp.lt.s32.totalorder %s317_s10, %s317_s10 }
   0xb   :  { %p324_p6 = por %p323_p5, %p322_p4 }
   0xd   :  { %p325_p7 = pnand %p324_p6, %p318_p3 }
   0xf   :  { %328 = shalt.err (!%p325_p7)
}
  0x10   :  { %s378_s11 = smov 128   ;;  %s379_s12 = smov 8  }
  0x11   :  { %36 = dma.hbm_to_vmem [thread:$0]  %s483_s1, 256, %s31_s25, [#allocation6], %s378_s11, %s378_s11, %s379_s12  }
  0x12   :  { %s380_s15 = smov [#allocation3]   ;;  %s381_s17 = smov [#allocation7]  }
  0x13   :  { %s21_s16 = sshll.u32 %s380_s15, 4  ;;  %s44_s18 = sshll.u32 %s381_s17, 4  ;;  %s22_s16 = int_to_ptr.vmem [resolvable:$true] %s21_s16  ;;  %s45_s18 = int_to_ptr.vmem [resolvable:$true] %s44_s18 }
  0x14   :  { %s329_s21 = scalar_lea.hbm %s482_s0, 128 }
  0x15   :  { %p330_p8 = scmp.ne.s32.totalorder %s482_s0, %s329_s21  ;;  %p333_p9 = scmp.lt.u32.totalorder %s329_s21, %s482_s0 }
  0x17   :  { %p335_p10 = pnand %p333_p9, %p330_p8 }
  0x19   :  { %338 = shalt.err (!%p335_p10)
}
  0x1a   :  { %s339_s1 = scalar_lea.vmem %s22_s16, 128  ;;  %p344_p12 = scmp.lt.s32.totalorder %s22_s16, %s22_s16 }
  0x1b   :  { %p340_p11 = scmp.ne.s32.totalorder %s22_s16, %s339_s1  ;;  %p345_p13 = scmp.lt.s32.totalorder %s339_s1, %s339_s1 }
  0x1d   :  { %p346_p0 = por %p345_p13, %p344_p12 }
  0x1f   :  { %p347_p1 = pnand %p346_p0, %p340_p11 }
  0x21   :  { %350 = shalt.err (!%p347_p1)
}
  0x22   :  { %24 = dma.hbm_to_vmem [thread:$0]  %s482_s0, 128, %s22_s16, [#allocation4]  }
  0x23   :  { %s351_s30 = scalar_lea.hbm %s485_s3, 512 }
  0x24   :  { %p352_p2 = scmp.ne.s32.totalorder %s485_s3, %s351_s30  ;;  %p355_p3 = scmp.lt.u32.totalorder %s351_s30, %s485_s3 }
  0x26   :  { %p357_p4 = pnand %p355_p3, %p352_p2 }
  0x28   :  { %360 = shalt.err (!%p357_p4)
}
  0x29   :  { %s361_s14 = scalar_lea.vmem %s45_s18, 512  ;;  %p366_p6 = scmp.lt.s32.totalorder %s45_s18, %s45_s18 }
  0x2a   :  { %p362_p5 = scmp.ne.s32.totalorder %s45_s18, %s361_s14  ;;  %p367_p7 = scmp.lt.s32.totalorder %s361_s14, %s361_s14 }
  0x2c   :  { %p368_p8 = por %p367_p7, %p366_p6 }
  0x2e   :  { %p369_p9 = pnand %p368_p8, %p362_p5 }
  0x30   :  { %372 = shalt.err (!%p369_p9)
}
  0x31   :  { %50 = dma.hbm_to_vmem [thread:$0]  %s485_s3, 512, %s45_s18, [#allocation6], %s378_s11, %s378_s11, %s379_s12  }
  0x32   :  { %373 = dma.done.wait [#allocation4], 128  }
  0x33   :  { %374 = vsyncadd [#allocation4], 4294967168 }
  0x34   :  { %375 = dma.done.wait [#allocation6], 768  }
  0x35   :  { %376 = vsyncadd [#allocation6], 4294966528  ;;  %v382_v0 = vmov 0.0|0.0   ;;  %vm383_vm0 = vmmov 0   ;;  %v384_v1 = vmov 0.0   ;;  %v67_v2 = vld [vmem:[#allocation5] sm:$0xff]  ;;  %v249_v25 = vstv %s488_s6 }
  0x36   :  { %290 = vmatprep.subr.bf16.mxu0 %v382_v0  ;;  %276 = vmatprep.mubr.msk.f32.mxu0 %vm383_vm0, %v384_v1  ;;  %v68_v3 = vld [vmem:[#allocation5 + $0x8] sm:$0xff]  ;;  %v151_v5 = vld [vmem:[#allocation7] sm:$0xff]  ;;  %v152_v6 = vld [vmem:[#allocation7 + $0x8] sm:$0xff]  ;;  %vm76_vm1 = vcmask 130048   ;;  %vm162_vm2 = vcmask 261120   ;;  %vm251_vm3 = vcmask 7168  }
  0x37   :  { %293 = vmatprep.subr.bf16.mxu1 %v382_v0  ;;  %287 = vmatprep.mubr.msk.f32.mxu1 %vm383_vm0, %v384_v1  ;;  %v291_v4 = vpack.c.bf16 %v68_v3, %v67_v2  ;;  %v294_v7 = vpack.c.bf16 %v152_v6, %v151_v5  ;;  %v66_v8 = vld [vmem:[#allocation3] sm:$0xff]  ;;  %v153_v9 = vld [vmem:[#allocation7 + $0x10] sm:$0xff]  ;;  %v154_v10 = vld [vmem:[#allocation7 + $0x18] sm:$0xff] }
  0x38   :  { %v297_v11 = vpack.c.bf16 %v154_v10, %v153_v9  ;;  %v259_v12 = vld [vmem:[%s484_s2] ss:$0 sm:$0xff] }
  0x39   :  { %292 = vmatpush3.bf16.msra.mxu0 %v291_v4  ;;  %295 = vmatpush3.bf16.msra.mxu1 %v294_v7  ;;  %v261_v17 = vld [vmem:[%s486_s4] ss:$0 sm:$0xff] }
  0x3a   :  { %296 = vmatprep.subr.bf16.mxu1 %v382_v0  ;;  %v263_v21 = vld [vmem:[%s487_s5] ss:$0 sm:$0xff] }
  0x3c   :  { %277 = vmatmul.mubr.msk.f32.vlgmr.msra.gmra.mrb[0].mxu0 %vm76_vm1, %v66_v8 }
  0x3d   :  { %298 = vmatpush3.bf16.msra.mxu1 %v297_v11 }
 0x10f   :  { %v146_v13 = vpop.f32.mrb[0].mxu0 }
 0x110   :  { %v147_v14 = vadd.f32 %v259_v12, %v146_v13  ;;  %v278_v15 = vpop.f32.mrb[1].mxu0 }
 0x112   :  { %v150_v16 = vmax.f32 %v147_v14, 0.0 }
 0x114   :  { %288 = vmatmul.mubr.msk.f32.vlgmr.msra.gmra.mrb[0].mxu1 %vm162_vm2, %v150_v16 }
 0x1e7   :  { %v232_v18 = vpop.f32.mrb[0].mxu1 }
 0x1e8   :  { %v233_v19 = vadd.f32 %v261_v17, %v232_v18  ;;  %v289_v20 = vpop.f32.mrb[1].mxu1 }
 0x1ea   :  { %v236_v22 = vmax.f32 %v233_v19, 0.0 }
 0x1ec   :  { %v244_v23 = vmul.f32 %v263_v21, %v236_v22 }
 0x1ee   :  { %v245_v24 = vsel %vm162_vm2, %v244_v23, 0.0 }
 0x1ef   :  { %246 = vadd.xlane.f32.xlu0 %v245_v24 }
 0x27c   :  { %v247_v26 = vpop.xlane.xlu0 %246 }
 0x27d   :  { %v250_v27 = vadd.f32 %v249_v25, %v247_v26 }
 0x27f   :  { %252 = vst.msk [vmem:[%s489_s7] sm:$0xff] %vm251_vm3, %v250_v27 }
 0x280   :  { %257 = vsyncpa [#allocation4], 1 }
 0x281   :  { %258 = vsyncpa [#allocation6], 1 }

</bundles_post_ra>
